<compile_context>
chip_gen: v7x
topology: tpu7x:2x2x1
jax: 0.10.0
libtpu: 0.0.40
codegen_flags: <defaults>
</compile_context>

<pallas_src>
import numpy as np
import jax
import jax.numpy as jnp
from jax.experimental import pallas as pl
from jax.experimental.pallas import tpu as pltpu


# ----------------------------------------------------------------------------
# Kernel
# ----------------------------------------------------------------------------
def _timeconv_kernel(convw_ref, convb_ref, x_ref, fcw_ref, fcb_ref, out_ref):
    """One grid step processes BB batch elements with the full [T, D] extent.

    convw_ref: SMEM [C, W]    temporal taps (Conv2d kernel is (W, 1))
    convb_ref: SMEM [C]       conv bias
    x_ref:     VMEM [BB, T, D]
    fcw_ref:   VMEM [C*D, O]  fc.weight.T in the MXU operand dtype (bf16 default)
    fcb_ref:   VMEM [1, O]    fc bias (f32)
    out_ref:   VMEM [BB, T, O]
    """
    BB, T, D = x_ref.shape
    C, W = convw_ref.shape
    O = out_ref.shape[-1]
    pad = (W - 1) // 2

    x = x_ref[...].astype(jnp.float32)                        # [BB, T, D]
    if pad > 0:
        zpad = jnp.zeros((BB, pad, D), jnp.float32)
        xp = jnp.concatenate([zpad, x, zpad], axis=1)         # [BB, T+W-1, D]
    else:
        xp = x
    # Hoist the W shifted time-windows out of the channel loop (W copies,
    # reused by every channel, instead of C*W per-channel slices).
    wins = [xp[:, k:k + T, :] for k in range(W)]

    # Temporal conv per output channel (C, W small & static -> unrolled).
    # Bias is folded into the ReLU: no zeros+broadcast accumulator init.
    chans = []
    for c in range(C):
        conv_c = convw_ref[c, 0] * wins[0]
        for k in range(1, W):
            conv_c = conv_c + convw_ref[c, k] * wins[k]
        chans.append(jnp.maximum(conv_c + convb_ref[c], 0.0))

    # Pack channels along the lane axis in torch's flatten order
    # (flat feature index = c*D + d) and run ONE MXU matmul with K = C*D.
    packed = jnp.concatenate(chans, axis=-1)                  # [BB, T, C*D] f32
    lhs = packed.reshape(BB * T, C * D).astype(fcw_ref.dtype) # bf16 MXU operand
    acc = jnp.dot(lhs, fcw_ref[...],
                  preferred_element_type=jnp.float32)         # [BB*T, O] f32 acc
    acc = jnp.maximum(acc + fcb_ref[...], 0.0)                # fc bias + ReLU
    out_ref[...] = acc.reshape(BB, T, O).astype(out_ref.dtype)


# ----------------------------------------------------------------------------
# Block-size planning (generation aware)
# ----------------------------------------------------------------------------
def _vmem_capacity_bytes():
    try:
        info = pltpu.get_tpu_info()
        cap = getattr(info, "vmem_capacity_bytes", None)
        if cap:
            return int(cap)
    except Exception:
        pass
    return 64 << 20   # conservative default = v7x per-TensorCore VMEM


def _has_two_tensorcores():
    try:
        kind = jax.devices()[0].device_kind.lower()
        return ("v7" in kind) or ("7x" in kind)
    except Exception:
        return False


def _plan_blocks(B, T, D, W, C, O, x_itemsize, mxu_itemsize):
    """Pick the batch block size BB and an explicit VMEM limit."""
    capacity = _vmem_capacity_bytes()
    # Per-batch-element VMEM (bytes): pipelined IO blocks + in-kernel temps.
    per_b = (
        2 * T * (D + O) * x_itemsize        # double-buffered input/output blocks
        + 4 * T * D * (2 + W)               # f32 copy of x, padded xp, W windows
        + 4 * T * C * D * 2                 # per-channel bufs + lane-packed f32
        + mxu_itemsize * T * C * D          # packed MXU operand
        + 4 * T * O                         # f32 matmul accumulator
    )
    fixed = 2 * C * D * O * mxu_itemsize + 8 * O + 4096   # fc weight/bias (+slack)
    budget = max(per_b, int(capacity * 0.45) - fixed)
    bb = max(1, min(B, budget // per_b))
    if _has_two_tensorcores() and B >= 2:
        # Keep >= 2 "parallel" grid steps so both v7x TensorCores get work.
        bb = min(bb, pl.cdiv(B, 2))
    est = fixed + bb * per_b
    vmem_limit = int(min(0.7 * capacity, max(32 << 20, 2 * est)))
    return int(bb), vmem_limit


# ----------------------------------------------------------------------------
# Wrapper
# ----------------------------------------------------------------------------
def time_conv(x, conv_w, conv_b, fc_w, fc_b, *, block_b=None,
              mxu_dtype=jnp.bfloat16):
    """Forward pass of TimeConv.

    x:      [B, T, D]
    conv_w: [C, 1, W, 1]   (torch Conv2d weight)
    conv_b: [C]
    fc_w:   [O, C*D]       (torch Linear weight)
    fc_b:   [O]
    returns [B, T, O]
    """
    B, T, D = x.shape
    C, _, W, _ = conv_w.shape
    O = fc_w.shape[0]
    assert fc_w.shape[1] == C * D
    assert W % 2 == 1 and W > 0, "TimeConv requires an odd window_size"

    x_itemsize = jnp.dtype(x.dtype).itemsize
    mxu_itemsize = jnp.dtype(mxu_dtype).itemsize
    bb_auto, vmem_limit = _plan_blocks(B, T, D, W, C, O, x_itemsize, mxu_itemsize)
    BB = int(block_b) if block_b is not None else bb_auto

    grid_b = int(pl.cdiv(B, BB))
    B_pad = grid_b * BB
    x_in = x if B_pad == B else jnp.pad(x, ((0, B_pad - B), (0, 0), (0, 0)))

    convw2 = conv_w.reshape(C, W).astype(jnp.float32)         # SMEM scalar taps
    convb1 = conv_b.reshape(C).astype(jnp.float32)            # SMEM scalar bias
    # fc.weight.T -> [C*D, O], kept in the MXU operand dtype (bf16 by default).
    fcw_r = jnp.transpose(fc_w, (1, 0)).astype(mxu_dtype)
    fcb2 = fc_b.reshape(1, O).astype(jnp.float32)

    def build(single_buffer_weights):
        shared = ({"pipeline_mode": pl.Buffered(1)}
                  if single_buffer_weights else {})
        return pl.pallas_call(
            _timeconv_kernel,
            out_shape=jax.ShapeDtypeStruct((B_pad, T, O), x.dtype),
            grid=(grid_b,),
            in_specs=[
                pl.BlockSpec(memory_space=pltpu.MemorySpace.SMEM),   # conv taps
                pl.BlockSpec(memory_space=pltpu.MemorySpace.SMEM),   # conv bias
                pl.BlockSpec((BB, T, D), lambda b: (b, 0, 0)),       # input block
                pl.BlockSpec((C * D, O), lambda b: (0, 0), **shared),  # fc weight
                pl.BlockSpec((1, O), lambda b: (0, 0), **shared),      # fc bias
            ],
            out_specs=pl.BlockSpec((BB, T, O), lambda b: (b, 0, 0)),
            compiler_params=pltpu.CompilerParams(
                dimension_semantics=("parallel",),
                vmem_limit_bytes=vmem_limit),
        )

    try:
        out = build(True)(convw2, convb1, x_in, fcw_r, fcb2)
    except Exception:
        # Some Pallas builds reject pipeline_mode on pallas_call BlockSpecs:
        # fall back to default double-buffered shared operands.
        out = build(False)(convw2, convb1, x_in, fcw_r, fcb2)
    return out[:B] if B_pad != B else out


# ----------------------------------------------------------------------------
# Pure-JAX reference (mirrors the torch module exactly, full f32)
# ----------------------------------------------------------------------------
def _ref_time_conv(x, conv_w, conv_b, fc_w, fc_b):
    B, T, D = x.shape
    C, _, W, _ = conv_w.shape
    pad = (W - 1) // 2
    xp = jnp.pad(x, ((0, 0), (pad, pad), (0, 0)))
    chans = []
    for c in range(C):
        acc = conv_b[c] + sum(conv_w[c, 0, k, 0] * xp[:, k:k + T, :]
                              for k in range(W))
        chans.append(acc)
    conv = jax.nn.relu(jnp.stack(chans, axis=1))          # [B, C, T, D]
    flat = jnp.transpose(conv, (0, 2, 1, 3)).reshape(B, T, C * D)
    return jax.nn.relu(flat @ fc_w.T + fc_b)


# ----------------------------------------------------------------------------
# Deterministic parameter init (xavier_normal-like, gain=sqrt(2))
# ----------------------------------------------------------------------------
def _xavier_normal(key, shape, gain=np.sqrt(2)):
    fan_out, fan_in = shape
    std = gain * np.sqrt(2.0 / (fan_in + fan_out))
    return std * jax.random.normal(key, shape, dtype=jnp.float32)


if __name__ == "__main__":
    B, T, D = 2, 8, 32       # batch, time, feature dim
    W_SZ, C, O = 3, 4, 32    # window_size, out_channel, output_size

    key = jax.random.PRNGKey(0)
    k1, k2, k3, k4, k5 = jax.random.split(key, 5)

    x = jax.random.normal(k1, (B, T, D), dtype=jnp.float32)
    conv_w = 0.3 * jax.random.normal(k2, (C, 1, W_SZ, 1), dtype=jnp.float32)
    conv_b = 0.1 * jax.random.normal(k3, (C,), dtype=jnp.float32)
    fc_w = _xavier_normal(k4, (O, C * D))
    fc_b = jnp.zeros((O,), dtype=jnp.float32)

    ref = _ref_time_conv(x, conv_w, conv_b, fc_w, fc_b)

    # 1) default performance path: bf16 MXU operands, f32 accumulation.
    out = time_conv(x, conv_w, conv_b, fc_w, fc_b)
    jax.block_until_ready(out)
    np.testing.assert_allclose(np.asarray(out), np.asarray(ref),
                               rtol=5e-2, atol=5e-2)

    # 2) exact-f32 operand path: proves the kernel matches the module semantics.
    out_f32 = time_conv(x, conv_w, conv_b, fc_w, fc_b, mxu_dtype=jnp.float32)
    jax.block_until_ready(out_f32)
    np.testing.assert_allclose(np.asarray(out_f32), np.asarray(ref),
                               rtol=1e-4, atol=1e-4)

    # 3) awkward batch size exercises the cdiv grid + zero-padded final block.
    B2 = 5
    x2 = jax.random.normal(k5, (B2, T, D), dtype=jnp.float32)
    out2 = time_conv(x2, conv_w, conv_b, fc_w, fc_b)
    jax.block_until_ready(out2)
    ref2 = _ref_time_conv(x2, conv_w, conv_b, fc_w, fc_b)
    np.testing.assert_allclose(np.asarray(out2), np.asarray(ref2),
                               rtol=5e-2, atol=5e-2)

    print("KERNEL_OK")
</pallas_src>

<mosaic_0001>
module attributes {stable_mosaic.version = 11 : i64} {
  func.func @_timeconv_kernel(%arg0: i32, %arg1: memref<4x3xf32, #tpu.memory_space<smem>>, %arg2: memref<4xf32, #tpu.memory_space<smem>>, %arg3: memref<2x8x32xf32, #tpu.memory_space<vmem>>, %arg4: memref<128x32xbf16, #tpu.memory_space<vmem>>, %arg5: memref<1x32xf32, #tpu.memory_space<vmem>>, %arg6: memref<2x8x32xf32, #tpu.memory_space<vmem>>) attributes {dimension_semantics = [#tpu.dimension_semantics<parallel>], iteration_bounds = array<i64: 1>, scalar_prefetch = 0 : i64, scratch_operands = 0 : i64, tpu.core_type = #tpu.core_type<tc>, window_params = [{transform_indices = @transform_0, window_bounds = array<i64: 4, 3>}, {transform_indices = @transform_1, window_bounds = array<i64: 4>}, {transform_indices = @transform_2, window_bounds = array<i64: 2, 8, 32>}, {pipeline_mode = #tpu.pipeline_mode<synchronous>, transform_indices = @transform_3, window_bounds = array<i64: 128, 32>}, {pipeline_mode = #tpu.pipeline_mode<synchronous>, transform_indices = @transform_4, window_bounds = array<i64: 1, 32>}, {transform_indices = @transform_5, window_bounds = array<i64: 2, 8, 32>}]} {
    %c0 = arith.constant 0 : index
    %c0_0 = arith.constant 0 : index
    %c0_1 = arith.constant 0 : index
    %0 = vector.load %arg3[%c0, %c0_0, %c0_1] : memref<2x8x32xf32, #tpu.memory_space<vmem>>, vector<2x8x32xf32>
    %cst = arith.constant 0.000000e+00 : f32
    %1 = vector.broadcast %cst : f32 to vector<2x1x32xf32>
    %2 = tpu.concatenate %1, %0, %1 in 1 : vector<2x1x32xf32>, vector<2x8x32xf32>, vector<2x1x32xf32> -> vector<2x10x32xf32>
    %3 = vector.extract_strided_slice %2 {offsets = [0, 0, 0], sizes = [2, 8, 32], strides = [1, 1, 1]} : vector<2x10x32xf32> to vector<2x8x32xf32>
    %4 = vector.extract_strided_slice %2 {offsets = [0, 1, 0], sizes = [2, 8, 32], strides = [1, 1, 1]} : vector<2x10x32xf32> to vector<2x8x32xf32>
    %5 = vector.extract_strided_slice %2 {offsets = [0, 2, 0], sizes = [2, 8, 32], strides = [1, 1, 1]} : vector<2x10x32xf32> to vector<2x8x32xf32>
    %c0_2 = arith.constant 0 : index
    %c0_3 = arith.constant 0 : index
    %6 = memref.load %arg1[%c0_2, %c0_3] : memref<4x3xf32, #tpu.memory_space<smem>>
    %7 = vector.broadcast %6 : f32 to vector<2x8x32xf32>
    %8 = arith.mulf %7, %3 : vector<2x8x32xf32>
    %c0_4 = arith.constant 0 : index
    %c1 = arith.constant 1 : index
    %9 = memref.load %arg1[%c0_4, %c1] : memref<4x3xf32, #tpu.memory_space<smem>>
    %10 = vector.broadcast %9 : f32 to vector<2x8x32xf32>
    %11 = arith.mulf %10, %4 : vector<2x8x32xf32>
    %12 = arith.addf %8, %11 : vector<2x8x32xf32>
    %c0_5 = arith.constant 0 : index
    %c2 = arith.constant 2 : index
    %13 = memref.load %arg1[%c0_5, %c2] : memref<4x3xf32, #tpu.memory_space<smem>>
    %14 = vector.broadcast %13 : f32 to vector<2x8x32xf32>
    %15 = arith.mulf %14, %5 : vector<2x8x32xf32>
    %16 = arith.addf %12, %15 : vector<2x8x32xf32>
    %c0_6 = arith.constant 0 : index
    %17 = memref.load %arg2[%c0_6] : memref<4xf32, #tpu.memory_space<smem>>
    %18 = vector.broadcast %17 : f32 to vector<2x8x32xf32>
    %19 = arith.addf %16, %18 : vector<2x8x32xf32>
    %cst_7 = arith.constant 0.000000e+00 : f32
    %20 = vector.broadcast %cst_7 : f32 to vector<2x8x32xf32>
    %21 = arith.maximumf %19, %20 : vector<2x8x32xf32>
    %c1_8 = arith.constant 1 : index
    %c0_9 = arith.constant 0 : index
    %22 = memref.load %arg1[%c1_8, %c0_9] : memref<4x3xf32, #tpu.memory_space<smem>>
    %23 = vector.broadcast %22 : f32 to vector<2x8x32xf32>
    %24 = arith.mulf %23, %3 : vector<2x8x32xf32>
    %c1_10 = arith.constant 1 : index
    %c1_11 = arith.constant 1 : index
    %25 = memref.load %arg1[%c1_10, %c1_11] : memref<4x3xf32, #tpu.memory_space<smem>>
    %26 = vector.broadcast %25 : f32 to vector<2x8x32xf32>
    %27 = arith.mulf %26, %4 : vector<2x8x32xf32>
    %28 = arith.addf %24, %27 : vector<2x8x32xf32>
    %c1_12 = arith.constant 1 : index
    %c2_13 = arith.constant 2 : index
    %29 = memref.load %arg1[%c1_12, %c2_13] : memref<4x3xf32, #tpu.memory_space<smem>>
    %30 = vector.broadcast %29 : f32 to vector<2x8x32xf32>
    %31 = arith.mulf %30, %5 : vector<2x8x32xf32>
    %32 = arith.addf %28, %31 : vector<2x8x32xf32>
    %c1_14 = arith.constant 1 : index
    %33 = memref.load %arg2[%c1_14] : memref<4xf32, #tpu.memory_space<smem>>
    %34 = vector.broadcast %33 : f32 to vector<2x8x32xf32>
    %35 = arith.addf %32, %34 : vector<2x8x32xf32>
    %cst_15 = arith.constant 0.000000e+00 : f32
    %36 = vector.broadcast %cst_15 : f32 to vector<2x8x32xf32>
    %37 = arith.maximumf %35, %36 : vector<2x8x32xf32>
    %c2_16 = arith.constant 2 : index
    %c0_17 = arith.constant 0 : index
    %38 = memref.load %arg1[%c2_16, %c0_17] : memref<4x3xf32, #tpu.memory_space<smem>>
    %39 = vector.broadcast %38 : f32 to vector<2x8x32xf32>
    %40 = arith.mulf %39, %3 : vector<2x8x32xf32>
    %c2_18 = arith.constant 2 : index
    %c1_19 = arith.constant 1 : index
    %41 = memref.load %arg1[%c2_18, %c1_19] : memref<4x3xf32, #tpu.memory_space<smem>>
    %42 = vector.broadcast %41 : f32 to vector<2x8x32xf32>
    %43 = arith.mulf %42, %4 : vector<2x8x32xf32>
    %44 = arith.addf %40, %43 : vector<2x8x32xf32>
    %c2_20 = arith.constant 2 : index
    %c2_21 = arith.constant 2 : index
    %45 = memref.load %arg1[%c2_20, %c2_21] : memref<4x3xf32, #tpu.memory_space<smem>>
    %46 = vector.broadcast %45 : f32 to vector<2x8x32xf32>
    %47 = arith.mulf %46, %5 : vector<2x8x32xf32>
    %48 = arith.addf %44, %47 : vector<2x8x32xf32>
    %c2_22 = arith.constant 2 : index
    %49 = memref.load %arg2[%c2_22] : memref<4xf32, #tpu.memory_space<smem>>
    %50 = vector.broadcast %49 : f32 to vector<2x8x32xf32>
    %51 = arith.addf %48, %50 : vector<2x8x32xf32>
    %cst_23 = arith.constant 0.000000e+00 : f32
    %52 = vector.broadcast %cst_23 : f32 to vector<2x8x32xf32>
    %53 = arith.maximumf %51, %52 : vector<2x8x32xf32>
    %c3 = arith.constant 3 : index
    %c0_24 = arith.constant 0 : index
    %54 = memref.load %arg1[%c3, %c0_24] : memref<4x3xf32, #tpu.memory_space<smem>>
    %55 = vector.broadcast %54 : f32 to vector<2x8x32xf32>
    %56 = arith.mulf %55, %3 : vector<2x8x32xf32>
    %c3_25 = arith.constant 3 : index
    %c1_26 = arith.constant 1 : index
    %57 = memref.load %arg1[%c3_25, %c1_26] : memref<4x3xf32, #tpu.memory_space<smem>>
    %58 = vector.broadcast %57 : f32 to vector<2x8x32xf32>
    %59 = arith.mulf %58, %4 : vector<2x8x32xf32>
    %60 = arith.addf %56, %59 : vector<2x8x32xf32>
    %c3_27 = arith.constant 3 : index
    %c2_28 = arith.constant 2 : index
    %61 = memref.load %arg1[%c3_27, %c2_28] : memref<4x3xf32, #tpu.memory_space<smem>>
    %62 = vector.broadcast %61 : f32 to vector<2x8x32xf32>
    %63 = arith.mulf %62, %5 : vector<2x8x32xf32>
    %64 = arith.addf %60, %63 : vector<2x8x32xf32>
    %c3_29 = arith.constant 3 : index
    %65 = memref.load %arg2[%c3_29] : memref<4xf32, #tpu.memory_space<smem>>
    %66 = vector.broadcast %65 : f32 to vector<2x8x32xf32>
    %67 = arith.addf %64, %66 : vector<2x8x32xf32>
    %cst_30 = arith.constant 0.000000e+00 : f32
    %68 = vector.broadcast %cst_30 : f32 to vector<2x8x32xf32>
    %69 = arith.maximumf %67, %68 : vector<2x8x32xf32>
    %70 = tpu.concatenate %21, %37, %53, %69 in 2 : vector<2x8x32xf32>, vector<2x8x32xf32>, vector<2x8x32xf32>, vector<2x8x32xf32> -> vector<2x8x128xf32>
    %71 = vector.shape_cast %70 : vector<2x8x128xf32> to vector<16x128xf32>
    %72 = arith.truncf %71 : vector<16x128xf32> to vector<16x128xbf16>
    %c0_31 = arith.constant 0 : index
    %c0_32 = arith.constant 0 : index
    %73 = vector.load %arg4[%c0_31, %c0_32] : memref<128x32xbf16, #tpu.memory_space<vmem>>, vector<128x32xbf16>
    %cst_33 = arith.constant dense<0.000000e+00> : vector<16x32xf32>
    %74 = tpu.matmul %72, %73, %cst_33 {dimension_numbers = #tpu.dot_dimension_numbers<[1], [0], [0], [1], [0, 0, 1, 1], [], []>} : vector<16x128xbf16>, vector<128x32xbf16>, vector<16x32xf32> -> vector<16x32xf32>
    %c0_34 = arith.constant 0 : index
    %c0_35 = arith.constant 0 : index
    %75 = vector.load %arg5[%c0_34, %c0_35] : memref<1x32xf32, #tpu.memory_space<vmem>>, vector<1x32xf32>
    %76 = vector.broadcast %75 : vector<1x32xf32> to vector<16x32xf32>
    %77 = arith.addf %74, %76 : vector<16x32xf32>
    %cst_36 = arith.constant 0.000000e+00 : f32
    %78 = vector.broadcast %cst_36 : f32 to vector<16x32xf32>
    %79 = arith.maximumf %77, %78 : vector<16x32xf32>
    %80 = vector.shape_cast %79 : vector<16x32xf32> to vector<2x8x32xf32>
    %c0_37 = arith.constant 0 : index
    %c0_38 = arith.constant 0 : index
    %c0_39 = arith.constant 0 : index
    %81 = vector.load %arg6[%c0_37, %c0_38, %c0_39] : memref<2x8x32xf32, #tpu.memory_space<vmem>>, vector<2x8x32xf32>
    tpu.vector_store %arg6[%c0_37, %c0_38, %c0_39], %80 {strides = array<i32>} : memref<2x8x32xf32, #tpu.memory_space<vmem>>, vector<2x8x32xf32>,
    return
  }
  func.func @transform_0(%arg0: i32) -> (i32, i32) {
    %c0_i32 = arith.constant 0 : i32
    %c0_i32_0 = arith.constant 0 : i32
    %c0_i32_1 = arith.constant 0 : i32
    return %c0_i32, %c0_i32_0 : i32, i32
  }
  func.func @transform_1(%arg0: i32) -> i32 {
    %c0_i32 = arith.constant 0 : i32
    %c0_i32_0 = arith.constant 0 : i32
    return %c0_i32 : i32
  }
  func.func @transform_2(%arg0: i32) -> (i32, i32, i32) {
    %c0_i32 = arith.constant 0 : i32
    %c0_i32_0 = arith.constant 0 : i32
    %c0_i32_1 = arith.constant 0 : i32
    return %arg0, %c0_i32, %c0_i32_0 : i32, i32, i32
  }
  func.func @transform_3(%arg0: i32) -> (i32, i32) {
    %c0_i32 = arith.constant 0 : i32
    %c0_i32_0 = arith.constant 0 : i32
    %c0_i32_1 = arith.constant 0 : i32
    return %c0_i32, %c0_i32_0 : i32, i32
  }
  func.func @transform_4(%arg0: i32) -> (i32, i32) {
    %c0_i32 = arith.constant 0 : i32
    %c0_i32_0 = arith.constant 0 : i32
    %c0_i32_1 = arith.constant 0 : i32
    return %c0_i32, %c0_i32_0 : i32, i32
  }
  func.func @transform_5(%arg0: i32) -> (i32, i32, i32) {
    %c0_i32 = arith.constant 0 : i32
    %c0_i32_0 = arith.constant 0 : i32
    %c0_i32_1 = arith.constant 0 : i32
    return %arg0, %c0_i32, %c0_i32_0 : i32, i32, i32
  }
}

module attributes {stable_mosaic.version = 11 : i64} {
  func.func @_timeconv_kernel(%arg0: i32, %arg1: memref<4x3xf32, #tpu.memory_space<smem>>, %arg2: memref<4xf32, #tpu.memory_space<smem>>, %arg3: memref<2x8x32xf32, #tpu.memory_space<vmem>>, %arg4: memref<128x32xbf16, #tpu.memory_space<vmem>>, %arg5: memref<1x32xf32, #tpu.memory_space<vmem>>, %arg6: memref<2x8x32xf32, #tpu.memory_space<vmem>>) attributes {dimension_semantics = [#tpu.dimension_semantics<parallel>], iteration_bounds = array<i64: 1>, scalar_prefetch = 0 : i64, scratch_operands = 0 : i64, tpu.core_type = #tpu.core_type<tc>, window_params = [{transform_indices = @transform_0, window_bounds = array<i64: 4, 3>}, {transform_indices = @transform_1, window_bounds = array<i64: 4>}, {transform_indices = @transform_2, window_bounds = array<i64: 2, 8, 32>}, {pipeline_mode = #tpu.pipeline_mode<synchronous>, transform_indices = @transform_3, window_bounds = array<i64: 128, 32>}, {pipeline_mode = #tpu.pipeline_mode<synchronous>, transform_indices = @transform_4, window_bounds = array<i64: 1, 32>}, {transform_indices = @transform_5, window_bounds = array<i64: 2, 8, 32>}]} {
    %c0 = arith.constant 0 : index
    %c0_0 = arith.constant 0 : index
    %c0_1 = arith.constant 0 : index
    %0 = vector.load %arg3[%c0, %c0_0, %c0_1] : memref<2x8x32xf32, #tpu.memory_space<vmem>>, vector<2x8x32xf32>
    %cst = arith.constant 0.000000e+00 : f32
    %1 = vector.broadcast %cst : f32 to vector<2x1x32xf32>
    %2 = tpu.concatenate %1, %0, %1 in 1 : vector<2x1x32xf32>, vector<2x8x32xf32>, vector<2x1x32xf32> -> vector<2x10x32xf32>
    %3 = vector.extract_strided_slice %2 {offsets = [0, 0, 0], sizes = [2, 8, 32], strides = [1, 1, 1]} : vector<2x10x32xf32> to vector<2x8x32xf32>
    %4 = vector.extract_strided_slice %2 {offsets = [0, 1, 0], sizes = [2, 8, 32], strides = [1, 1, 1]} : vector<2x10x32xf32> to vector<2x8x32xf32>
    %5 = vector.extract_strided_slice %2 {offsets = [0, 2, 0], sizes = [2, 8, 32], strides = [1, 1, 1]} : vector<2x10x32xf32> to vector<2x8x32xf32>
    %c0_2 = arith.constant 0 : index
    %c0_3 = arith.constant 0 : index
    %6 = memref.load %arg1[%c0_2, %c0_3] : memref<4x3xf32, #tpu.memory_space<smem>>
    %7 = vector.broadcast %6 : f32 to vector<2x8x32xf32>
    %8 = arith.mulf %7, %3 : vector<2x8x32xf32>
    %c0_4 = arith.constant 0 : index
    %c1 = arith.constant 1 : index
    %9 = memref.load %arg1[%c0_4, %c1] : memref<4x3xf32, #tpu.memory_space<smem>>
    %10 = vector.broadcast %9 : f32 to vector<2x8x32xf32>
    %11 = arith.mulf %10, %4 : vector<2x8x32xf32>
    %12 = arith.addf %8, %11 : vector<2x8x32xf32>
    %c0_5 = arith.constant 0 : index
    %c2 = arith.constant 2 : index
    %13 = memref.load %arg1[%c0_5, %c2] : memref<4x3xf32, #tpu.memory_space<smem>>
    %14 = vector.broadcast %13 : f32 to vector<2x8x32xf32>
    %15 = arith.mulf %14, %5 : vector<2x8x32xf32>
    %16 = arith.addf %12, %15 : vector<2x8x32xf32>
    %c0_6 = arith.constant 0 : index
    %17 = memref.load %arg2[%c0_6] : memref<4xf32, #tpu.memory_space<smem>>
    %18 = vector.broadcast %17 : f32 to vector<2x8x32xf32>
    %19 = arith.addf %16, %18 : vector<2x8x32xf32>
    %cst_7 = arith.constant 0.000000e+00 : f32
    %20 = vector.broadcast %cst_7 : f32 to vector<2x8x32xf32>
    %21 = arith.maximumf %19, %20 : vector<2x8x32xf32>
    %c1_8 = arith.constant 1 : index
    %c0_9 = arith.constant 0 : index
    %22 = memref.load %arg1[%c1_8, %c0_9] : memref<4x3xf32, #tpu.memory_space<smem>>
    %23 = vector.broadcast %22 : f32 to vector<2x8x32xf32>
    %24 = arith.mulf %23, %3 : vector<2x8x32xf32>
    %c1_10 = arith.constant 1 : index
    %c1_11 = arith.constant 1 : index
    %25 = memref.load %arg1[%c1_10, %c1_11] : memref<4x3xf32, #tpu.memory_space<smem>>
    %26 = vector.broadcast %25 : f32 to vector<2x8x32xf32>
    %27 = arith.mulf %26, %4 : vector<2x8x32xf32>
    %28 = arith.addf %24, %27 : vector<2x8x32xf32>
    %c1_12 = arith.constant 1 : index
    %c2_13 = arith.constant 2 : index
    %29 = memref.load %arg1[%c1_12, %c2_13] : memref<4x3xf32, #tpu.memory_space<smem>>
    %30 = vector.broadcast %29 : f32 to vector<2x8x32xf32>
    %31 = arith.mulf %30, %5 : vector<2x8x32xf32>
    %32 = arith.addf %28, %31 : vector<2x8x32xf32>
    %c1_14 = arith.constant 1 : index
    %33 = memref.load %arg2[%c1_14] : memref<4xf32, #tpu.memory_space<smem>>
    %34 = vector.broadcast %33 : f32 to vector<2x8x32xf32>
    %35 = arith.addf %32, %34 : vector<2x8x32xf32>
    %cst_15 = arith.constant 0.000000e+00 : f32
    %36 = vector.broadcast %cst_15 : f32 to vector<2x8x32xf32>
    %37 = arith.maximumf %35, %36 : vector<2x8x32xf32>
    %c2_16 = arith.constant 2 : index
    %c0_17 = arith.constant 0 : index
    %38 = memref.load %arg1[%c2_16, %c0_17] : memref<4x3xf32, #tpu.memory_space<smem>>
    %39 = vector.broadcast %38 : f32 to vector<2x8x32xf32>
    %40 = arith.mulf %39, %3 : vector<2x8x32xf32>
    %c2_18 = arith.constant 2 : index
    %c1_19 = arith.constant 1 : index
    %41 = memref.load %arg1[%c2_18, %c1_19] : memref<4x3xf32, #tpu.memory_space<smem>>
    %42 = vector.broadcast %41 : f32 to vector<2x8x32xf32>
    %43 = arith.mulf %42, %4 : vector<2x8x32xf32>
    %44 = arith.addf %40, %43 : vector<2x8x32xf32>
    %c2_20 = arith.constant 2 : index
    %c2_21 = arith.constant 2 : index
    %45 = memref.load %arg1[%c2_20, %c2_21] : memref<4x3xf32, #tpu.memory_space<smem>>
    %46 = vector.broadcast %45 : f32 to vector<2x8x32xf32>
    %47 = arith.mulf %46, %5 : vector<2x8x32xf32>
    %48 = arith.addf %44, %47 : vector<2x8x32xf32>
    %c2_22 = arith.constant 2 : index
    %49 = memref.load %arg2[%c2_22] : memref<4xf32, #tpu.memory_space<smem>>
    %50 = vector.broadcast %49 : f32 to vector<2x8x32xf32>
    %51 = arith.addf %48, %50 : vector<2x8x32xf32>
    %cst_23 = arith.constant 0.000000e+00 : f32
    %52 = vector.broadcast %cst_23 : f32 to vector<2x8x32xf32>
    %53 = arith.maximumf %51, %52 : vector<2x8x32xf32>
    %c3 = arith.constant 3 : index
    %c0_24 = arith.constant 0 : index
    %54 = memref.load %arg1[%c3, %c0_24] : memref<4x3xf32, #tpu.memory_space<smem>>
    %55 = vector.broadcast %54 : f32 to vector<2x8x32xf32>
    %56 = arith.mulf %55, %3 : vector<2x8x32xf32>
    %c3_25 = arith.constant 3 : index
    %c1_26 = arith.constant 1 : index
    %57 = memref.load %arg1[%c3_25, %c1_26] : memref<4x3xf32, #tpu.memory_space<smem>>
    %58 = vector.broadcast %57 : f32 to vector<2x8x32xf32>
    %59 = arith.mulf %58, %4 : vector<2x8x32xf32>
    %60 = arith.addf %56, %59 : vector<2x8x32xf32>
    %c3_27 = arith.constant 3 : index
    %c2_28 = arith.constant 2 : index
    %61 = memref.load %arg1[%c3_27, %c2_28] : memref<4x3xf32, #tpu.memory_space<smem>>
    %62 = vector.broadcast %61 : f32 to vector<2x8x32xf32>
    %63 = arith.mulf %62, %5 : vector<2x8x32xf32>
    %64 = arith.addf %60, %63 : vector<2x8x32xf32>
    %c3_29 = arith.constant 3 : index
    %65 = memref.load %arg2[%c3_29] : memref<4xf32, #tpu.memory_space<smem>>
    %66 = vector.broadcast %65 : f32 to vector<2x8x32xf32>
    %67 = arith.addf %64, %66 : vector<2x8x32xf32>
    %cst_30 = arith.constant 0.000000e+00 : f32
    %68 = vector.broadcast %cst_30 : f32 to vector<2x8x32xf32>
    %69 = arith.maximumf %67, %68 : vector<2x8x32xf32>
    %70 = tpu.concatenate %21, %37, %53, %69 in 2 : vector<2x8x32xf32>, vector<2x8x32xf32>, vector<2x8x32xf32>, vector<2x8x32xf32> -> vector<2x8x128xf32>
    %71 = vector.shape_cast %70 : vector<2x8x128xf32> to vector<16x128xf32>
    %72 = arith.truncf %71 : vector<16x128xf32> to vector<16x128xbf16>
    %c0_31 = arith.constant 0 : index
    %c0_32 = arith.constant 0 : index
    %73 = vector.load %arg4[%c0_31, %c0_32] : memref<128x32xbf16, #tpu.memory_space<vmem>>, vector<128x32xbf16>
    %cst_33 = arith.constant dense<0.000000e+00> : vector<16x32xf32>
    %74 = tpu.matmul %72, %73, %cst_33 {dimension_numbers = #tpu.dot_dimension_numbers<[1], [0], [0], [1], [0, 0, 1, 1], [], []>} : vector<16x128xbf16>, vector<128x32xbf16>, vector<16x32xf32> -> vector<16x32xf32>
    %c0_34 = arith.constant 0 : index
    %c0_35 = arith.constant 0 : index
    %75 = vector.load %arg5[%c0_34, %c0_35] : memref<1x32xf32, #tpu.memory_space<vmem>>, vector<1x32xf32>
    %76 = vector.broadcast %75 : vector<1x32xf32> to vector<16x32xf32>
    %77 = arith.addf %74, %76 : vector<16x32xf32>
    %cst_36 = arith.constant 0.000000e+00 : f32
    %78 = vector.broadcast %cst_36 : f32 to vector<16x32xf32>
    %79 = arith.maximumf %77, %78 : vector<16x32xf32>
    %80 = vector.shape_cast %79 : vector<16x32xf32> to vector<2x8x32xf32>
    %c0_37 = arith.constant 0 : index
    %c0_38 = arith.constant 0 : index
    %c0_39 = arith.constant 0 : index
    %81 = vector.load %arg6[%c0_37, %c0_38, %c0_39] : memref<2x8x32xf32, #tpu.memory_space<vmem>>, vector<2x8x32xf32>
    tpu.vector_store %arg6[%c0_37, %c0_38, %c0_39], %80 {strides = array<i32>} : memref<2x8x32xf32, #tpu.memory_space<vmem>>, vector<2x8x32xf32>,
    return
  }
  func.func @transform_0(%arg0: i32) -> (i32, i32) {
    %c0_i32 = arith.constant 0 : i32
    %c0_i32_0 = arith.constant 0 : i32
    %c0_i32_1 = arith.constant 0 : i32
    return %c0_i32, %c0_i32_0 : i32, i32
  }
  func.func @transform_1(%arg0: i32) -> i32 {
    %c0_i32 = arith.constant 0 : i32
    %c0_i32_0 = arith.constant 0 : i32
    return %c0_i32 : i32
  }
  func.func @transform_2(%arg0: i32) -> (i32, i32, i32) {
    %c0_i32 = arith.constant 0 : i32
    %c0_i32_0 = arith.constant 0 : i32
    %c0_i32_1 = arith.constant 0 : i32
    return %arg0, %c0_i32, %c0_i32_0 : i32, i32, i32
  }
  func.func @transform_3(%arg0: i32) -> (i32, i32) {
    %c0_i32 = arith.constant 0 : i32
    %c0_i32_0 = arith.constant 0 : i32
    %c0_i32_1 = arith.constant 0 : i32
    return %c0_i32, %c0_i32_0 : i32, i32
  }
  func.func @transform_4(%arg0: i32) -> (i32, i32) {
    %c0_i32 = arith.constant 0 : i32
    %c0_i32_0 = arith.constant 0 : i32
    %c0_i32_1 = arith.constant 0 : i32
    return %c0_i32, %c0_i32_0 : i32, i32
  }
  func.func @transform_5(%arg0: i32) -> (i32, i32, i32) {
    %c0_i32 = arith.constant 0 : i32
    %c0_i32_0 = arith.constant 0 : i32
    %c0_i32_1 = arith.constant 0 : i32
    return %arg0, %c0_i32, %c0_i32_0 : i32, i32, i32
  }
}

</mosaic_0001>

<bundles_post_ra>
// kernel: tpu_custom_call.1
= control target key start
LH: loop header
LB: loop body
LE: loop exit
PB: predicated region body
PF: predicated region fallthrough
CT: control target
= control target key end

     0   :  { %10 = vsyncpa [#allocation4], 0  ;;  %s775_s0 = inlined_call_operand.vmem [shape: f32[4,3], index: 0, kind: input, shape index: {}]   ;;  %s776_s1 = inlined_call_operand.vmem [shape: f32[4], index: 1, kind: input, shape index: {}]   ;;  %s777_s2 = inlined_call_operand.vmem [shape: f32[2,8,32], index: 2, kind: input, shape index: {}]   ;;  %s778_s3 = inlined_call_operand.vmem [shape: bf16[128,32], index: 3, kind: input, shape index: {}]   ;;  %s779_s4 = inlined_call_operand.vmem [shape: f32[1,32], index: 4, kind: input, shape index: {}]   ;;  %s780_s5 = inlined_call_operand.hbm [shape: f32[2,8,32], index: 5, kind: output, shape index: {}]  }
   0x1   :  { %11 = vsyncpa [#allocation6], 0 }
   0x2   :  { %12 = vsyncpa [#allocation3], 0  ;;  %s19_s20 = sshll.u32 %s775_s0, 4  ;;  %s29_s23 = sshll.u32 %s776_s1, 4  ;;  %s20_s20 = int_to_ptr.vmem [resolvable:$true] %s19_s20  ;;  %s30_s23 = int_to_ptr.vmem [resolvable:$true] %s29_s23 }
   0x3   :  { %s515_s24 = scalar_lea.vmem %s20_s20, 64  ;;  %p520_p1 = scmp.lt.s32.totalorder %s20_s20, %s20_s20 }
   0x4   :  { %p516_p0 = scmp.ne.s32.totalorder %s20_s20, %s515_s24  ;;  %p521_p2 = scmp.lt.s32.totalorder %s515_s24, %s515_s24 }
   0x6   :  { %p522_p3 = por %p521_p2, %p520_p1 }
   0x8   :  { %p523_p4 = pnand %p522_p3, %p516_p0 }
   0xa   :  { %526 = shalt.err (!%p523_p4)
}
   0xb   :  { %s567_s25 = smov [#allocation2]   ;;  %s527_s26 = scalar_lea.vmem %s30_s23, 16 }
   0xc   :  { %22 = dma.vmem_to_smem %s20_s20, 64, %s567_s25, [#allocation4]  }
   0xd   :  { %p528_p5 = scmp.ne.s32.totalorder %s30_s23, %s527_s26  ;;  %p532_p6 = scmp.lt.s32.totalorder %s30_s23, %s30_s23 }
   0xe   :  { %p533_p7 = scmp.lt.s32.totalorder %s527_s26, %s527_s26 }
  0x10   :  { %p534_p8 = por %p533_p7, %p532_p6 }
  0x12   :  { %p535_p9 = pnand %p534_p8, %p528_p5 }
  0x14   :  { %538 = shalt.err (!%p535_p9)
}
  0x15   :  { %s568_s0 = smov [#allocation5]  }
  0x16   :  { %32 = dma.vmem_to_smem %s30_s23, 16, %s568_s0, [#allocation6]  }
  0x17   :  { %561 = dma.done.wait [#allocation4], 64  }
  0x18   :  { %562 = vsyncadd [#allocation4], 4294967232 }
  0x19   :  { %563 = dma.done.wait [#allocation6], 16  }
  0x1a   :  { %564 = vsyncadd [#allocation6], 4294967280 }
  0x1b   :  { %45 = sfence }
  0x1c   :  { %v47_v0 = vld [vmem:[%s777_s2] sm:$0xff]  ;;  %v48_v1 = vld [vmem:[%s777_s2 + $0x8] sm:$0xff]  ;;  %vm55_vm0 = vcmask 1040384   ;;  %s432_s30 = sld [smem:[#allocation2 + $0x80]]  ;;  %s433_s6 = sld [smem:[#allocation2 + $0x81]]  ;;  %v569_v5 = vmov 0.0  }
  0x1d   :  { %v51_v2 = vrot.slane %v47_v0, 7  ;;  %v52_v3 = vrot.slane %v48_v1, 7  ;;  %s434_s7 = sld [smem:[#allocation2 + $0x82]]  ;;  %s619_s8 = sld [smem:[#allocation5 + $0x1]]  ;;  %v507_v4 = vld [vmem:[%s778_s3] sm:$0xff]   ;;  %462 = vmatprep.subr.bf16.mxu0 %v569_v5  ;;  %v508_v8 = vld [vmem:[%s778_s3 + $0x8] sm:$0xff]  }
  0x1e   :  { %s625_s11 = sld [smem:[#allocation2 + $0x100]]  ;;  %463 = vmatpush3.bf16.msra.mxu0 %v507_v4  ;;  %vm74_vm1 = vcmask 1046528   ;;  %vm95_vm2 = vcmask 1045504   ;;  %s643_s13 = sld [smem:[#allocation2 + $0x101]]  ;;  %v509_v17 = vld [vmem:[%s778_s3 + $0x10] sm:$0xff]   ;;  %v510_v34 = vld [vmem:[%s778_s3 + $0x18] sm:$0xff]  }
  0x1f   :  { %v628_v6 = vsel %vm55_vm0, 0.0, %v51_v2  ;;  %v631_v7 = vsel %vm55_vm0, %v51_v2, 0.0  ;;  %464 = vmatprep.subr.bf16.mxu0 %v569_v5  ;;  %v638_v9 = vsel %vm55_vm0, 0.0, %v52_v3  ;;  %v641_v10 = vsel %vm55_vm0, %v52_v3, 0.0  ;;  %s645_s14 = sld [smem:[#allocation2 + $0x102]]  ;;  %s677_s20 = sld [smem:[#allocation2 + $0x180]] }
  0x20   :  { %s672_s19 = sld [smem:[#allocation5 + $0x2]]  ;;  %s679_s21 = sld [smem:[#allocation2 + $0x181]]  ;;  %v511_v51 = vld [vmem:[%s778_s3 + $0x20] sm:$0xff]   ;;  %vm572_vm3 = vmmov 0   ;;  %vm286_vm4 = vcmask 261120   ;;  %vm289_vm5 = vcmask 523264  }
  0x21   :  { %s691_s24 = sld [smem:[#allocation2 + $0x182]]  ;;  %s701_s0 = sld [smem:[#allocation2]]  ;;  %478 = vmatprep.mubr.msk.bf16.mxu0 %vm572_vm3, %v569_v5  ;;  %vm292_vm6 = vcmask 785408  }
  0x22   :  { %v113_v11 = vstv %s432_s30  ;;  %v117_v12 = vstv %s433_s6  ;;  %465 = vmatpush3.bf16.msra.mxu0 %v508_v8  ;;  %s708_s1 = sld [smem:[#allocation5 + $0x3]]  ;;  %s570_s27 = smov 32  }
  0x23   :  { %v114_v13 = vmul.f32 %v113_v11, %v628_v6  ;;  %v115_v14 = vmul.f32 %v113_v11, %v638_v9  ;;  %v118_v15 = vmul.f32 %v117_v12, %v628_v6  ;;  %v119_v16 = vmul.f32 %v117_v12, %v631_v7  ;;  %466 = vmatprep.subr.bf16.mxu0 %v569_v5  ;;  %s712_s28 = sld [smem:[#allocation2 + $0x1]]  ;;  %s714_s29 = sld [smem:[#allocation2 + $0x2]] }
  0x24   :  { %v120_v18 = vmul.f32 %v117_v12, %v638_v9  ;;  %v121_v19 = vmul.f32 %v117_v12, %v641_v10  ;;  %v137_v20 = vstv %s434_s7  ;;  %v157_v21 = vstv %s619_s8  ;;  %s571_s9 = smov 64   ;;  %s106_s10 = sld [smem:[#allocation5]] }
  0x25   :  { %v126_v22 = vrot.slane %v118_v15, 1  ;;  %v127_v23 = vrot.slane %v119_v16, 1  ;;  %v138_v24 = vmul.f32 %v137_v20, %v628_v6  ;;  %v139_v25 = vmul.f32 %v137_v20, %v631_v7  ;;  %s574_s12 = smov [#allocation7]  }
  0x26   :  { %v129_v26 = vrot.slane %v120_v18, 1  ;;  %v130_v27 = vrot.slane %v121_v19, 1  ;;  %v140_v28 = vmul.f32 %v137_v20, %v638_v9  ;;  %v141_v29 = vmul.f32 %v137_v20, %v641_v10  ;;  %467 = vmatpush3.bf16.msra.mxu0 %v509_v17 }
  0x27   :  { %v128_v30 = vsel %vm74_vm1, %v126_v22, %v127_v23  ;;  %v146_v31 = vrot.slane %v138_v24, 2  ;;  %v147_v32 = vrot.slane %v139_v25, 2  ;;  %v163_v33 = vstv %s625_s11  ;;  %468 = vmatprep.subr.bf16.mxu0 %v569_v5 }
  0x28   :  { %v131_v35 = vsel %vm74_vm1, %v129_v26, %v130_v27  ;;  %v134_v36 = vadd.f32 %v128_v30, %v114_v13  ;;  %v149_v37 = vrot.slane %v140_v28, 2  ;;  %v150_v38 = vrot.slane %v141_v29, 2  ;;  %v512_v13 = vld [vmem:[%s778_s3 + $0x28] sm:$0xff]   ;;  %v513_v29 = vld [vmem:[%s778_s3 + $0x30] sm:$0xff]  }
  0x29   :  { %v135_v39 = vadd.f32 %v131_v35, %v115_v14  ;;  %v148_v40 = vsel %vm95_vm2, %v146_v31, %v147_v32  ;;  %v164_v41 = vmul.f32 %v163_v33, %v628_v6  ;;  %v165_v42 = vmul.f32 %v163_v33, %v638_v9 }
  0x2a   :  { %v151_v43 = vsel %vm95_vm2, %v149_v37, %v150_v38  ;;  %v154_v44 = vadd.f32 %v148_v40, %v134_v36  ;;  %v167_v45 = vstv %s643_s13  ;;  %v187_v46 = vstv %s645_s14  ;;  %469 = vmatpush3.bf16.msra.mxu0 %v510_v34  ;;  %s417_s13 = sshll.u32 %s574_s12, 4  ;;  %s418_s13 = int_to_ptr.vmem [resolvable:$true] %s417_s13 }
  0x2b   :  { %v155_v47 = vadd.f32 %v151_v43, %v135_v39  ;;  %v168_v48 = vmul.f32 %v167_v45, %v628_v6  ;;  %v169_v49 = vmul.f32 %v167_v45, %v631_v7  ;;  %v170_v50 = vmul.f32 %v167_v45, %v638_v9  ;;  %470 = vmatprep.subr.bf16.mxu0 %v569_v5  ;;  %s539_s14 = scalar_lea.vmem %s418_s13, 256  ;;  %p544_p11 = scmp.lt.s32.totalorder %s418_s13, %s418_s13 }
  0x2c   :  { %v158_v52 = vadd.f32 %v157_v21, %v154_v44  ;;  %v171_v53 = vmul.f32 %v167_v45, %v641_v10  ;;  %v188_v54 = vmul.f32 %v187_v46, %v628_v6  ;;  %v189_v55 = vmul.f32 %v187_v46, %v631_v7  ;;  %p540_p10 = scmp.ne.s32.totalorder %s418_s13, %s539_s14  ;;  %p545_p12 = scmp.lt.s32.totalorder %s539_s14, %s539_s14 }
  0x2d   :  { %v159_v56 = vadd.f32 %v157_v21, %v155_v47  ;;  %v176_v57 = vrot.slane %v168_v48, 1  ;;  %v177_v58 = vrot.slane %v169_v49, 1  ;;  %v179_v59 = vrot.slane %v170_v50, 1 }
  0x2e   :  { %v160_v60 = vmax.f32 %v158_v52, 0.0  ;;  %v180_v61 = vrot.slane %v171_v53, 1  ;;  %v190_v62 = vmul.f32 %v187_v46, %v638_v9  ;;  %v191_v63 = vmul.f32 %v187_v46, %v641_v10  ;;  %471 = vmatpush3.bf16.msra.mxu0 %v511_v51  ;;  %v514_v46 = vld [vmem:[%s778_s3 + $0x38] sm:$0xff]   ;;  %s573_s3 = smov 96   ;;  %p546_p13 = por %p545_p12, %p544_p11 }
  0x2f   :  { %v161_v0 = vmax.f32 %v159_v56, 0.0  ;;  %v178_v1 = vsel %vm74_vm1, %v176_v57, %v177_v58  ;;  %v196_v2 = vrot.slane %v188_v54, 2  ;;  %v197_v3 = vrot.slane %v189_v55, 2  ;;  %472 = vmatprep.subr.bf16.mxu0 %v569_v5 }
  0x30   :  { %v181_v4 = vsel %vm74_vm1, %v179_v59, %v180_v61  ;;  %v184_v8 = vadd.f32 %v178_v1, %v164_v41  ;;  %v199_v11 = vrot.slane %v190_v62, 2  ;;  %v200_v12 = vrot.slane %v191_v63, 2  ;;  %p547_p0 = pnand %p546_p13, %p540_p10 }
  0x31   :  { %v492_v14 = vpack.i.bf16 %v161_v0, %v160_v60  ;;  %v185_v15 = vadd.f32 %v181_v4, %v165_v42  ;;  %v198_v16 = vsel %vm95_vm2, %v196_v2, %v197_v3  ;;  %v207_v17 = vstv %s672_s19 }
  0x32   :  { %v201_v18 = vsel %vm95_vm2, %v199_v11, %v200_v12  ;;  %v204_v19 = vadd.f32 %v198_v16, %v184_v8  ;;  %v213_v20 = vstv %s677_s20  ;;  %v217_v21 = vstv %s679_s21  ;;  %473 = vmatpush3.bf16.msra.mxu0 %v512_v13 }
  0x33   :  { %493 = vrot.lane.b32.xlu0 %v492_v14, %s570_s27  ;;  %v205_v22 = vadd.f32 %v201_v18, %v185_v15  ;;  %v214_v23 = vmul.f32 %v213_v20, %v628_v6  ;;  %v218_v24 = vmul.f32 %v217_v21, %v628_v6  ;;  %v219_v26 = vmul.f32 %v217_v21, %v631_v7 }
  0x34   :  { %v208_v25 = vadd.f32 %v207_v17, %v204_v19  ;;  %v220_v27 = vmul.f32 %v217_v21, %v638_v9  ;;  %v221_v28 = vmul.f32 %v217_v21, %v641_v10  ;;  %v215_v31 = vmul.f32 %v213_v20, %v638_v9  ;;  %474 = vmatprep.subr.bf16.mxu0 %v569_v5 }
  0x35   :  { %v209_v30 = vadd.f32 %v207_v17, %v205_v22  ;;  %v226_v32 = vrot.slane %v218_v24, 1  ;;  %v237_v33 = vstv %s691_s24  ;;  %v227_v35 = vrot.slane %v219_v26, 1 }
  0x36   :  { %v210_v34 = vmax.f32 %v208_v25, 0.0  ;;  %v229_v36 = vrot.slane %v220_v27, 1  ;;  %v230_v37 = vrot.slane %v221_v28, 1  ;;  %v238_v39 = vmul.f32 %v237_v33, %v628_v6  ;;  %475 = vmatpush3.bf16.msra.mxu0 %v513_v29 }
  0x37   :  { %v211_v38 = vmax.f32 %v209_v30, 0.0  ;;  %v239_v40 = vmul.f32 %v237_v33, %v631_v7  ;;  %v240_v41 = vmul.f32 %v237_v33, %v638_v9  ;;  %v228_v42 = vsel %vm74_vm1, %v226_v32, %v227_v35  ;;  %476 = vmatprep.subr.bf16.mxu0 %v569_v5 }
  0x38   :  { %v231_v43 = vsel %vm74_vm1, %v229_v36, %v230_v37  ;;  %v241_v44 = vmul.f32 %v237_v33, %v641_v10  ;;  %v61_v45 = vstv %s701_s0  ;;  %v234_v48 = vadd.f32 %v228_v42, %v214_v23 }
  0x39   :  { %v497_v47 = vpack.i.bf16 %v211_v38, %v210_v34  ;;  %v235_v49 = vadd.f32 %v231_v43, %v215_v31  ;;  %v246_v50 = vrot.slane %v238_v39, 2  ;;  %v247_v51 = vrot.slane %v239_v40, 2 }
  0x3a   :  { %v249_v52 = vrot.slane %v240_v41, 2  ;;  %v250_v53 = vrot.slane %v241_v44, 2  ;;  %v257_v54 = vstv %s708_s1  ;;  %v63_v55 = vmul.f32 %v61_v45, %v638_v9  ;;  %477 = vmatpush3.bf16.msra.mxu0 %v514_v46 }
  0x3b   :  { %498 = vrot.lane.b32.xlu0 %v497_v47, %s571_s9  ;;  %v65_v56 = vstv %s712_s28  ;;  %v86_v57 = vstv %s714_s29  ;;  %v248_v58 = vsel %vm95_vm2, %v246_v50, %v247_v51  ;;  %v62_v17 = vmul.f32 %v61_v45, %v628_v6 }
  0x3c   :  { %v251_v59 = vsel %vm95_vm2, %v249_v52, %v250_v53  ;;  %v67_v60 = vmul.f32 %v65_v56, %v631_v7  ;;  %v68_v61 = vmul.f32 %v65_v56, %v638_v9  ;;  %v254_v62 = vadd.f32 %v248_v58, %v234_v48 }
  0x3d   :  { %v255_v63 = vadd.f32 %v251_v59, %v235_v49  ;;  %v69_v0 = vmul.f32 %v65_v56, %v641_v10  ;;  %v88_v1 = vmul.f32 %v86_v57, %v631_v7  ;;  %v89_v4 = vmul.f32 %v86_v57, %v638_v9  ;;  %v444_v49 = vld [vmem:[%s779_s4] ss:$0 sm:$0xff] }
  0x3e   :  { %v76_v2 = vrot.slane %v67_v60, 1  ;;  %v78_v3 = vrot.slane %v68_v61, 1  ;;  %v90_v8 = vmul.f32 %v86_v57, %v641_v10  ;;  %v258_v11 = vadd.f32 %v257_v54, %v254_v62 }
  0x3f   :  { %v259_v12 = vadd.f32 %v257_v54, %v255_v63  ;;  %v79_v13 = vrot.slane %v69_v0, 1  ;;  %v97_v14 = vrot.slane %v88_v1, 2  ;;  %v99_v15 = vrot.slane %v89_v4, 2 }
  0x40   :  { %v100_v16 = vrot.slane %v90_v8, 2  ;;  %v66_v18 = vmul.f32 %v65_v56, %v628_v6  ;;  %v260_v19 = vmax.f32 %v258_v11, 0.0  ;;  %v87_v21 = vmul.f32 %v86_v57, %v628_v6 }
  0x41   :  { %v261_v20 = vmax.f32 %v259_v12, 0.0  ;;  %v80_v7 = vsel %vm74_vm1, %v78_v3, %v79_v13  ;;  %v107_v30 = vstv %s106_s10 }
  0x42   :  { %v84_v22 = vadd.f32 %v80_v7, %v63_v55  ;;  %v101_v9 = vsel %vm95_vm2, %v99_v15, %v100_v16  ;;  %v75_v10 = vrot.slane %v66_v18, 1  ;;  %v96_v24 = vrot.slane %v87_v21, 2 }
  0x43   :  { %v502_v23 = vpack.i.bf16 %v261_v20, %v260_v19 }
  0x44   :  { %v105_v25 = vadd.f32 %v101_v9, %v84_v22  ;;  %v77_v26 = vsel %vm74_vm1, %v75_v10, %v76_v2  ;;  %v98_v28 = vsel %vm95_vm2, %v96_v24, %v97_v14 }
  0x45   :  { %503 = vrot.lane.b32.xlu1 %v502_v23, %s573_s3  ;;  %v83_v27 = vadd.f32 %v77_v26, %v62_v17 }
  0x46   :  { %v109_v31 = vadd.f32 %v107_v30, %v105_v25 }
  0x47   :  { %v104_v29 = vadd.f32 %v98_v28, %v83_v27 }
  0x48   :  { %v111_v34 = vmax.f32 %v109_v31, 0.0 }
  0x49   :  { %v108_v32 = vadd.f32 %v107_v30, %v104_v29 }
  0x4b   :  { %v110_v37 = vmax.f32 %v108_v32, 0.0 }
  0xa5   :  { %v494_v6 = vpop.permute.xlu0 %493 }
  0xa6   :  { %v496_v35 = vunpack.i.h.bf16 %v494_v6  ;;  %v495_v36 = vunpack.i.l.bf16 %v494_v6 }
  0xa8   :  { %v288_v5 = vsel %vm286_vm4, %v111_v34, %v496_v35  ;;  %v287_v40 = vsel %vm286_vm4, %v110_v37, %v495_v36 }
  0xad   :  { %v499_v33 = vpop.permute.xlu0 %498 }
  0xae   :  { %v501_v38 = vunpack.i.h.bf16 %v499_v33  ;;  %v500_v39 = vunpack.i.l.bf16 %v499_v33 }
  0xb0   :  { %v290_v41 = vsel %vm289_vm5, %v287_v40, %v500_v39  ;;  %v291_v42 = vsel %vm289_vm5, %v288_v5, %v501_v38 }
  0xb7   :  { %v504_v43 = vpop.permute.xlu1 %503 }
  0xb8   :  { %v506_v44 = vunpack.i.h.bf16 %v504_v43  ;;  %v505_v45 = vunpack.i.l.bf16 %v504_v43 }
  0xba   :  { %v293_v46 = vsel %vm292_vm6, %v290_v41, %v505_v45  ;;  %v294_v47 = vsel %vm292_vm6, %v291_v42, %v506_v44 }
  0xbb   :  { %v295_v48 = vpack.c.bf16 %v294_v47, %v293_v46 }
  0xbd   :  { %479 = vmatmul.mubr.bf16.vlgmr.msra.gmra.mrb[0].mxu0 %v295_v48 }
 0x190   :  { %v401_v50 = vpop.f32.mrb[0].mxu0 }
 0x191   :  { %v402_v51 = vadd.f32 %v444_v49, %v401_v50  ;;  %v480_v52 = vpop.f32.mrb[1].mxu0 }
 0x192   :  { %v404_v53 = vpop.f32.mrb[2].mxu0 }
 0x193   :  { %v408_v54 = vmax.f32 %v402_v51, 0.0  ;;  %v405_v55 = vadd.f32 %v444_v49, %v404_v53  ;;  %v481_v56 = vpop.f32.mrb[3].mxu0 }
 0x195   :  { %410 = vst.msk [vmem:[#allocation7] sm:$0xff] %vm286_vm4, %v408_v54  ;;  %v409_v57 = vmax.f32 %v405_v55, 0.0 }
 0x197   :  { %411 = vst.msk [vmem:[#allocation7 + $0x8] sm:$0xff] %vm286_vm4, %v409_v57 }
 0x198   :  { %550 = shalt.err (!%p547_p0)
}
 0x199   :  { %s551_s16 = scalar_lea.hbm %s780_s5, 256 }
 0x19a   :  { %p552_p1 = scmp.ne.s32.totalorder %s780_s5, %s551_s16  ;;  %p555_p2 = scmp.lt.u32.totalorder %s551_s16, %s780_s5 }
 0x19c   :  { %p557_p3 = pnand %p555_p2, %p552_p1 }
 0x19e   :  { %560 = shalt.err (!%p557_p3)
}
 0x19f   :  { %s575_s21 = smov 128   ;;  %s576_s22 = smov 8  }
 0x1a0   :  { %423 = dma.vmem_to_hbm [thread:$0]  %s418_s13, 256, %s780_s5, [#allocation3], %s575_s21, %s575_s21, %s576_s22  }
 0x1a1   :  { %565 = dma.done.wait [#allocation3], 256  }
 0x1a2   :  { %566 = vsyncadd [#allocation3], 4294967040 }
 0x1a3   :  { %427 = vsyncpa [#allocation3], 1 }
 0x1a4   :  { %428 = vsyncpa [#allocation4], 1 }
 0x1a5   :  { %429 = vsyncpa [#allocation6], 1 }

// kernel: tpu_custom_call.1
= control target key start
LH: loop header
LB: loop body
LE: loop exit
PB: predicated region body
PF: predicated region fallthrough
CT: control target
= control target key end

     0   :  { %10 = vsyncpa [#allocation4], 0  ;;  %s775_s0 = inlined_call_operand.vmem [shape: f32[4,3], index: 0, kind: input, shape index: {}]   ;;  %s776_s1 = inlined_call_operand.vmem [shape: f32[4], index: 1, kind: input, shape index: {}]   ;;  %s777_s2 = inlined_call_operand.vmem [shape: f32[2,8,32], index: 2, kind: input, shape index: {}]   ;;  %s778_s3 = inlined_call_operand.vmem [shape: bf16[128,32], index: 3, kind: input, shape index: {}]   ;;  %s779_s4 = inlined_call_operand.vmem [shape: f32[1,32], index: 4, kind: input, shape index: {}]   ;;  %s780_s5 = inlined_call_operand.hbm [shape: f32[2,8,32], index: 5, kind: output, shape index: {}]  }
   0x1   :  { %11 = vsyncpa [#allocation6], 0 }
   0x2   :  { %12 = vsyncpa [#allocation3], 0  ;;  %s19_s20 = sshll.u32 %s775_s0, 4  ;;  %s29_s23 = sshll.u32 %s776_s1, 4  ;;  %s20_s20 = int_to_ptr.vmem [resolvable:$true] %s19_s20  ;;  %s30_s23 = int_to_ptr.vmem [resolvable:$true] %s29_s23 }
   0x3   :  { %s515_s24 = scalar_lea.vmem %s20_s20, 64  ;;  %p520_p1 = scmp.lt.s32.totalorder %s20_s20, %s20_s20 }
   0x4   :  { %p516_p0 = scmp.ne.s32.totalorder %s20_s20, %s515_s24  ;;  %p521_p2 = scmp.lt.s32.totalorder %s515_s24, %s515_s24 }
   0x6   :  { %p522_p3 = por %p521_p2, %p520_p1 }
   0x8   :  { %p523_p4 = pnand %p522_p3, %p516_p0 }
   0xa   :  { %526 = shalt.err (!%p523_p4)
}
   0xb   :  { %s567_s25 = smov [#allocation2]   ;;  %s527_s26 = scalar_lea.vmem %s30_s23, 16 }
   0xc   :  { %22 = dma.vmem_to_smem %s20_s20, 64, %s567_s25, [#allocation4]  }
   0xd   :  { %p528_p5 = scmp.ne.s32.totalorder %s30_s23, %s527_s26  ;;  %p532_p6 = scmp.lt.s32.totalorder %s30_s23, %s30_s23 }
   0xe   :  { %p533_p7 = scmp.lt.s32.totalorder %s527_s26, %s527_s26 }
  0x10   :  { %p534_p8 = por %p533_p7, %p532_p6 }
  0x12   :  { %p535_p9 = pnand %p534_p8, %p528_p5 }
  0x14   :  { %538 = shalt.err (!%p535_p9)
}
  0x15   :  { %s568_s0 = smov [#allocation5]  }
  0x16   :  { %32 = dma.vmem_to_smem %s30_s23, 16, %s568_s0, [#allocation6]  }
  0x17   :  { %561 = dma.done.wait [#allocation4], 64  }
  0x18   :  { %562 = vsyncadd [#allocation4], 4294967232 }
  0x19   :  { %563 = dma.done.wait [#allocation6], 16  }
  0x1a   :  { %564 = vsyncadd [#allocation6], 4294967280 }
  0x1b   :  { %45 = sfence }
  0x1c   :  { %v47_v0 = vld [vmem:[%s777_s2] sm:$0xff]  ;;  %v48_v1 = vld [vmem:[%s777_s2 + $0x8] sm:$0xff]  ;;  %vm55_vm0 = vcmask 1040384   ;;  %s432_s30 = sld [smem:[#allocation2 + $0x80]]  ;;  %s433_s6 = sld [smem:[#allocation2 + $0x81]]  ;;  %v569_v5 = vmov 0.0  }
  0x1d   :  { %v51_v2 = vrot.slane %v47_v0, 7  ;;  %v52_v3 = vrot.slane %v48_v1, 7  ;;  %s434_s7 = sld [smem:[#allocation2 + $0x82]]  ;;  %s619_s8 = sld [smem:[#allocation5 + $0x1]]  ;;  %v507_v4 = vld [vmem:[%s778_s3] sm:$0xff]   ;;  %462 = vmatprep.subr.bf16.mxu0 %v569_v5  ;;  %v508_v8 = vld [vmem:[%s778_s3 + $0x8] sm:$0xff]  }
  0x1e   :  { %s625_s11 = sld [smem:[#allocation2 + $0x100]]  ;;  %463 = vmatpush3.bf16.msra.mxu0 %v507_v4  ;;  %vm74_vm1 = vcmask 1046528   ;;  %vm95_vm2 = vcmask 1045504   ;;  %s643_s13 = sld [smem:[#allocation2 + $0x101]]  ;;  %v509_v17 = vld [vmem:[%s778_s3 + $0x10] sm:$0xff]   ;;  %v510_v34 = vld [vmem:[%s778_s3 + $0x18] sm:$0xff]  }
  0x1f   :  { %v628_v6 = vsel %vm55_vm0, 0.0, %v51_v2  ;;  %v631_v7 = vsel %vm55_vm0, %v51_v2, 0.0  ;;  %464 = vmatprep.subr.bf16.mxu0 %v569_v5  ;;  %v638_v9 = vsel %vm55_vm0, 0.0, %v52_v3  ;;  %v641_v10 = vsel %vm55_vm0, %v52_v3, 0.0  ;;  %s645_s14 = sld [smem:[#allocation2 + $0x102]]  ;;  %s677_s20 = sld [smem:[#allocation2 + $0x180]] }
  0x20   :  { %s672_s19 = sld [smem:[#allocation5 + $0x2]]  ;;  %s679_s21 = sld [smem:[#allocation2 + $0x181]]  ;;  %v511_v51 = vld [vmem:[%s778_s3 + $0x20] sm:$0xff]   ;;  %vm572_vm3 = vmmov 0   ;;  %vm286_vm4 = vcmask 261120   ;;  %vm289_vm5 = vcmask 523264  }
  0x21   :  { %s691_s24 = sld [smem:[#allocation2 + $0x182]]  ;;  %s701_s0 = sld [smem:[#allocation2]]  ;;  %478 = vmatprep.mubr.msk.bf16.mxu0 %vm572_vm3, %v569_v5  ;;  %vm292_vm6 = vcmask 785408  }
  0x22   :  { %v113_v11 = vstv %s432_s30  ;;  %v117_v12 = vstv %s433_s6  ;;  %465 = vmatpush3.bf16.msra.mxu0 %v508_v8  ;;  %s708_s1 = sld [smem:[#allocation5 + $0x3]]  ;;  %s570_s27 = smov 32  }
  0x23   :  { %v114_v13 = vmul.f32 %v113_v11, %v628_v6  ;;  %v115_v14 = vmul.f32 %v113_v11, %v638_v9  ;;  %v118_v15 = vmul.f32 %v117_v12, %v628_v6  ;;  %v119_v16 = vmul.f32 %v117_v12, %v631_v7  ;;  %466 = vmatprep.subr.bf16.mxu0 %v569_v5  ;;  %s712_s28 = sld [smem:[#allocation2 + $0x1]]  ;;  %s714_s29 = sld [smem:[#allocation2 + $0x2]] }
  0x24   :  { %v120_v18 = vmul.f32 %v117_v12, %v638_v9  ;;  %v121_v19 = vmul.f32 %v117_v12, %v641_v10  ;;  %v137_v20 = vstv %s434_s7  ;;  %v157_v21 = vstv %s619_s8  ;;  %s571_s9 = smov 64   ;;  %s106_s10 = sld [smem:[#allocation5]] }
  0x25   :  { %v126_v22 = vrot.slane %v118_v15, 1  ;;  %v127_v23 = vrot.slane %v119_v16, 1  ;;  %v138_v24 = vmul.f32 %v137_v20, %v628_v6  ;;  %v139_v25 = vmul.f32 %v137_v20, %v631_v7  ;;  %s574_s12 = smov [#allocation7]  }
  0x26   :  { %v129_v26 = vrot.slane %v120_v18, 1  ;;  %v130_v27 = vrot.slane %v121_v19, 1  ;;  %v140_v28 = vmul.f32 %v137_v20, %v638_v9  ;;  %v141_v29 = vmul.f32 %v137_v20, %v641_v10  ;;  %467 = vmatpush3.bf16.msra.mxu0 %v509_v17 }
  0x27   :  { %v128_v30 = vsel %vm74_vm1, %v126_v22, %v127_v23  ;;  %v146_v31 = vrot.slane %v138_v24, 2  ;;  %v147_v32 = vrot.slane %v139_v25, 2  ;;  %v163_v33 = vstv %s625_s11  ;;  %468 = vmatprep.subr.bf16.mxu0 %v569_v5 }
  0x28   :  { %v131_v35 = vsel %vm74_vm1, %v129_v26, %v130_v27  ;;  %v134_v36 = vadd.f32 %v128_v30, %v114_v13  ;;  %v149_v37 = vrot.slane %v140_v28, 2  ;;  %v150_v38 = vrot.slane %v141_v29, 2  ;;  %v512_v13 = vld [vmem:[%s778_s3 + $0x28] sm:$0xff]   ;;  %v513_v29 = vld [vmem:[%s778_s3 + $0x30] sm:$0xff]  }
  0x29   :  { %v135_v39 = vadd.f32 %v131_v35, %v115_v14  ;;  %v148_v40 = vsel %vm95_vm2, %v146_v31, %v147_v32  ;;  %v164_v41 = vmul.f32 %v163_v33, %v628_v6  ;;  %v165_v42 = vmul.f32 %v163_v33, %v638_v9 }
  0x2a   :  { %v151_v43 = vsel %vm95_vm2, %v149_v37, %v150_v38  ;;  %v154_v44 = vadd.f32 %v148_v40, %v134_v36  ;;  %v167_v45 = vstv %s643_s13  ;;  %v187_v46 = vstv %s645_s14  ;;  %469 = vmatpush3.bf16.msra.mxu0 %v510_v34  ;;  %s417_s13 = sshll.u32 %s574_s12, 4  ;;  %s418_s13 = int_to_ptr.vmem [resolvable:$true] %s417_s13 }
  0x2b   :  { %v155_v47 = vadd.f32 %v151_v43, %v135_v39  ;;  %v168_v48 = vmul.f32 %v167_v45, %v628_v6  ;;  %v169_v49 = vmul.f32 %v167_v45, %v631_v7  ;;  %v170_v50 = vmul.f32 %v167_v45, %v638_v9  ;;  %470 = vmatprep.subr.bf16.mxu0 %v569_v5  ;;  %s539_s14 = scalar_lea.vmem %s418_s13, 256  ;;  %p544_p11 = scmp.lt.s32.totalorder %s418_s13, %s418_s13 }
  0x2c   :  { %v158_v52 = vadd.f32 %v157_v21, %v154_v44  ;;  %v171_v53 = vmul.f32 %v167_v45, %v641_v10  ;;  %v188_v54 = vmul.f32 %v187_v46, %v628_v6  ;;  %v189_v55 = vmul.f32 %v187_v46, %v631_v7  ;;  %p540_p10 = scmp.ne.s32.totalorder %s418_s13, %s539_s14  ;;  %p545_p12 = scmp.lt.s32.totalorder %s539_s14, %s539_s14 }
  0x2d   :  { %v159_v56 = vadd.f32 %v157_v21, %v155_v47  ;;  %v176_v57 = vrot.slane %v168_v48, 1  ;;  %v177_v58 = vrot.slane %v169_v49, 1  ;;  %v179_v59 = vrot.slane %v170_v50, 1 }
  0x2e   :  { %v160_v60 = vmax.f32 %v158_v52, 0.0  ;;  %v180_v61 = vrot.slane %v171_v53, 1  ;;  %v190_v62 = vmul.f32 %v187_v46, %v638_v9  ;;  %v191_v63 = vmul.f32 %v187_v46, %v641_v10  ;;  %471 = vmatpush3.bf16.msra.mxu0 %v511_v51  ;;  %v514_v46 = vld [vmem:[%s778_s3 + $0x38] sm:$0xff]   ;;  %s573_s3 = smov 96   ;;  %p546_p13 = por %p545_p12, %p544_p11 }
  0x2f   :  { %v161_v0 = vmax.f32 %v159_v56, 0.0  ;;  %v178_v1 = vsel %vm74_vm1, %v176_v57, %v177_v58  ;;  %v196_v2 = vrot.slane %v188_v54, 2  ;;  %v197_v3 = vrot.slane %v189_v55, 2  ;;  %472 = vmatprep.subr.bf16.mxu0 %v569_v5 }
  0x30   :  { %v181_v4 = vsel %vm74_vm1, %v179_v59, %v180_v61  ;;  %v184_v8 = vadd.f32 %v178_v1, %v164_v41  ;;  %v199_v11 = vrot.slane %v190_v62, 2  ;;  %v200_v12 = vrot.slane %v191_v63, 2  ;;  %p547_p0 = pnand %p546_p13, %p540_p10 }
  0x31   :  { %v492_v14 = vpack.i.bf16 %v161_v0, %v160_v60  ;;  %v185_v15 = vadd.f32 %v181_v4, %v165_v42  ;;  %v198_v16 = vsel %vm95_vm2, %v196_v2, %v197_v3  ;;  %v207_v17 = vstv %s672_s19 }
  0x32   :  { %v201_v18 = vsel %vm95_vm2, %v199_v11, %v200_v12  ;;  %v204_v19 = vadd.f32 %v198_v16, %v184_v8  ;;  %v213_v20 = vstv %s677_s20  ;;  %v217_v21 = vstv %s679_s21  ;;  %473 = vmatpush3.bf16.msra.mxu0 %v512_v13 }
  0x33   :  { %493 = vrot.lane.b32.xlu0 %v492_v14, %s570_s27  ;;  %v205_v22 = vadd.f32 %v201_v18, %v185_v15  ;;  %v214_v23 = vmul.f32 %v213_v20, %v628_v6  ;;  %v218_v24 = vmul.f32 %v217_v21, %v628_v6  ;;  %v219_v26 = vmul.f32 %v217_v21, %v631_v7 }
  0x34   :  { %v208_v25 = vadd.f32 %v207_v17, %v204_v19  ;;  %v220_v27 = vmul.f32 %v217_v21, %v638_v9  ;;  %v221_v28 = vmul.f32 %v217_v21, %v641_v10  ;;  %v215_v31 = vmul.f32 %v213_v20, %v638_v9  ;;  %474 = vmatprep.subr.bf16.mxu0 %v569_v5 }
  0x35   :  { %v209_v30 = vadd.f32 %v207_v17, %v205_v22  ;;  %v226_v32 = vrot.slane %v218_v24, 1  ;;  %v237_v33 = vstv %s691_s24  ;;  %v227_v35 = vrot.slane %v219_v26, 1 }
  0x36   :  { %v210_v34 = vmax.f32 %v208_v25, 0.0  ;;  %v229_v36 = vrot.slane %v220_v27, 1  ;;  %v230_v37 = vrot.slane %v221_v28, 1  ;;  %v238_v39 = vmul.f32 %v237_v33, %v628_v6  ;;  %475 = vmatpush3.bf16.msra.mxu0 %v513_v29 }
  0x37   :  { %v211_v38 = vmax.f32 %v209_v30, 0.0  ;;  %v239_v40 = vmul.f32 %v237_v33, %v631_v7  ;;  %v240_v41 = vmul.f32 %v237_v33, %v638_v9  ;;  %v228_v42 = vsel %vm74_vm1, %v226_v32, %v227_v35  ;;  %476 = vmatprep.subr.bf16.mxu0 %v569_v5 }
  0x38   :  { %v231_v43 = vsel %vm74_vm1, %v229_v36, %v230_v37  ;;  %v241_v44 = vmul.f32 %v237_v33, %v641_v10  ;;  %v61_v45 = vstv %s701_s0  ;;  %v234_v48 = vadd.f32 %v228_v42, %v214_v23 }
  0x39   :  { %v497_v47 = vpack.i.bf16 %v211_v38, %v210_v34  ;;  %v235_v49 = vadd.f32 %v231_v43, %v215_v31  ;;  %v246_v50 = vrot.slane %v238_v39, 2  ;;  %v247_v51 = vrot.slane %v239_v40, 2 }
  0x3a   :  { %v249_v52 = vrot.slane %v240_v41, 2  ;;  %v250_v53 = vrot.slane %v241_v44, 2  ;;  %v257_v54 = vstv %s708_s1  ;;  %v63_v55 = vmul.f32 %v61_v45, %v638_v9  ;;  %477 = vmatpush3.bf16.msra.mxu0 %v514_v46 }
  0x3b   :  { %498 = vrot.lane.b32.xlu0 %v497_v47, %s571_s9  ;;  %v65_v56 = vstv %s712_s28  ;;  %v86_v57 = vstv %s714_s29  ;;  %v248_v58 = vsel %vm95_vm2, %v246_v50, %v247_v51  ;;  %v62_v17 = vmul.f32 %v61_v45, %v628_v6 }
  0x3c   :  { %v251_v59 = vsel %vm95_vm2, %v249_v52, %v250_v53  ;;  %v67_v60 = vmul.f32 %v65_v56, %v631_v7  ;;  %v68_v61 = vmul.f32 %v65_v56, %v638_v9  ;;  %v254_v62 = vadd.f32 %v248_v58, %v234_v48 }
  0x3d   :  { %v255_v63 = vadd.f32 %v251_v59, %v235_v49  ;;  %v69_v0 = vmul.f32 %v65_v56, %v641_v10  ;;  %v88_v1 = vmul.f32 %v86_v57, %v631_v7  ;;  %v89_v4 = vmul.f32 %v86_v57, %v638_v9  ;;  %v444_v49 = vld [vmem:[%s779_s4] ss:$0 sm:$0xff] }
  0x3e   :  { %v76_v2 = vrot.slane %v67_v60, 1  ;;  %v78_v3 = vrot.slane %v68_v61, 1  ;;  %v90_v8 = vmul.f32 %v86_v57, %v641_v10  ;;  %v258_v11 = vadd.f32 %v257_v54, %v254_v62 }
  0x3f   :  { %v259_v12 = vadd.f32 %v257_v54, %v255_v63  ;;  %v79_v13 = vrot.slane %v69_v0, 1  ;;  %v97_v14 = vrot.slane %v88_v1, 2  ;;  %v99_v15 = vrot.slane %v89_v4, 2 }
  0x40   :  { %v100_v16 = vrot.slane %v90_v8, 2  ;;  %v66_v18 = vmul.f32 %v65_v56, %v628_v6  ;;  %v260_v19 = vmax.f32 %v258_v11, 0.0  ;;  %v87_v21 = vmul.f32 %v86_v57, %v628_v6 }
  0x41   :  { %v261_v20 = vmax.f32 %v259_v12, 0.0  ;;  %v80_v7 = vsel %vm74_vm1, %v78_v3, %v79_v13  ;;  %v107_v30 = vstv %s106_s10 }
  0x42   :  { %v84_v22 = vadd.f32 %v80_v7, %v63_v55  ;;  %v101_v9 = vsel %vm95_vm2, %v99_v15, %v100_v16  ;;  %v75_v10 = vrot.slane %v66_v18, 1  ;;  %v96_v24 = vrot.slane %v87_v21, 2 }
  0x43   :  { %v502_v23 = vpack.i.bf16 %v261_v20, %v260_v19 }
  0x44   :  { %v105_v25 = vadd.f32 %v101_v9, %v84_v22  ;;  %v77_v26 = vsel %vm74_vm1, %v75_v10, %v76_v2  ;;  %v98_v28 = vsel %vm95_vm2, %v96_v24, %v97_v14 }
  0x45   :  { %503 = vrot.lane.b32.xlu1 %v502_v23, %s573_s3  ;;  %v83_v27 = vadd.f32 %v77_v26, %v62_v17 }
  0x46   :  { %v109_v31 = vadd.f32 %v107_v30, %v105_v25 }
  0x47   :  { %v104_v29 = vadd.f32 %v98_v28, %v83_v27 }
  0x48   :  { %v111_v34 = vmax.f32 %v109_v31, 0.0 }
  0x49   :  { %v108_v32 = vadd.f32 %v107_v30, %v104_v29 }
  0x4b   :  { %v110_v37 = vmax.f32 %v108_v32, 0.0 }
  0xa5   :  { %v494_v6 = vpop.permute.xlu0 %493 }
  0xa6   :  { %v496_v35 = vunpack.i.h.bf16 %v494_v6  ;;  %v495_v36 = vunpack.i.l.bf16 %v494_v6 }
  0xa8   :  { %v288_v5 = vsel %vm286_vm4, %v111_v34, %v496_v35  ;;  %v287_v40 = vsel %vm286_vm4, %v110_v37, %v495_v36 }
  0xad   :  { %v499_v33 = vpop.permute.xlu0 %498 }
  0xae   :  { %v501_v38 = vunpack.i.h.bf16 %v499_v33  ;;  %v500_v39 = vunpack.i.l.bf16 %v499_v33 }
  0xb0   :  { %v290_v41 = vsel %vm289_vm5, %v287_v40, %v500_v39  ;;  %v291_v42 = vsel %vm289_vm5, %v288_v5, %v501_v38 }
  0xb7   :  { %v504_v43 = vpop.permute.xlu1 %503 }
  0xb8   :  { %v506_v44 = vunpack.i.h.bf16 %v504_v43  ;;  %v505_v45 = vunpack.i.l.bf16 %v504_v43 }
  0xba   :  { %v293_v46 = vsel %vm292_vm6, %v290_v41, %v505_v45  ;;  %v294_v47 = vsel %vm292_vm6, %v291_v42, %v506_v44 }
  0xbb   :  { %v295_v48 = vpack.c.bf16 %v294_v47, %v293_v46 }
  0xbd   :  { %479 = vmatmul.mubr.bf16.vlgmr.msra.gmra.mrb[0].mxu0 %v295_v48 }
 0x190   :  { %v401_v50 = vpop.f32.mrb[0].mxu0 }
 0x191   :  { %v402_v51 = vadd.f32 %v444_v49, %v401_v50  ;;  %v480_v52 = vpop.f32.mrb[1].mxu0 }
 0x192   :  { %v404_v53 = vpop.f32.mrb[2].mxu0 }
 0x193   :  { %v408_v54 = vmax.f32 %v402_v51, 0.0  ;;  %v405_v55 = vadd.f32 %v444_v49, %v404_v53  ;;  %v481_v56 = vpop.f32.mrb[3].mxu0 }
 0x195   :  { %410 = vst.msk [vmem:[#allocation7] sm:$0xff] %vm286_vm4, %v408_v54  ;;  %v409_v57 = vmax.f32 %v405_v55, 0.0 }
 0x197   :  { %411 = vst.msk [vmem:[#allocation7 + $0x8] sm:$0xff] %vm286_vm4, %v409_v57 }
 0x198   :  { %550 = shalt.err (!%p547_p0)
}
 0x199   :  { %s551_s16 = scalar_lea.hbm %s780_s5, 256 }
 0x19a   :  { %p552_p1 = scmp.ne.s32.totalorder %s780_s5, %s551_s16  ;;  %p555_p2 = scmp.lt.u32.totalorder %s551_s16, %s780_s5 }
 0x19c   :  { %p557_p3 = pnand %p555_p2, %p552_p1 }
 0x19e   :  { %560 = shalt.err (!%p557_p3)
}
 0x19f   :  { %s575_s21 = smov 128   ;;  %s576_s22 = smov 8  }
 0x1a0   :  { %423 = dma.vmem_to_hbm [thread:$0]  %s418_s13, 256, %s780_s5, [#allocation3], %s575_s21, %s575_s21, %s576_s22  }
 0x1a1   :  { %565 = dma.done.wait [#allocation3], 256  }
 0x1a2   :  { %566 = vsyncadd [#allocation3], 4294967040 }
 0x1a3   :  { %427 = vsyncpa [#allocation3], 1 }
 0x1a4   :  { %428 = vsyncpa [#allocation4], 1 }
 0x1a5   :  { %429 = vsyncpa [#allocation6], 1 }

</bundles_post_ra>
